<compile_context>
chip_gen: v6e
topology: v6e:2x2x1
jax: 0.10.0
libtpu: 0.0.40
codegen_flags: <defaults>
</compile_context>

<pallas_src>
import jax
import jax.numpy as jnp
from jax.experimental import pallas as pl
from jax.experimental.pallas import tpu as pltpu

_LANE = 128
_SUBLANE = 8


def _make_kernel(c_in, c_mid, c_out):
    # TODO(synk): for channel counts > ~16, switch to an MXU jnp.dot path with
    # weights in VMEM; the fully unrolled scalar-FMA loop below is intended
    # only for tiny attention heads like this one (4 -> 2 -> 8).
    def kernel(x_ref, w1_ref, b1_ref, w2_ref, b2_ref, o_ref):
        # x_ref:  (1, c_in, S, 128)  VMEM, sublane-dense per channel
        # w1_ref: (c_mid, c_in)      SMEM scalars (conv1 weight, 1x1 == matmul)
        # b1_ref: (c_mid,)           SMEM
        # w2_ref: (c_out, c_mid)     SMEM
        # b2_ref: (c_out,)           SMEM
        # o_ref:  (1, c_out, S, 128) VMEM
        xs = [x_ref[0, k].astype(jnp.float32) for k in range(c_in)]  # (S,128)

        # conv1 + ReLU: h_m = relu(sum_k w1[m,k] * x_k + b1[m])
        hs = []
        for m in range(c_mid):
            acc = xs[0] * w1_ref[m, 0]
            for k in range(1, c_in):
                acc = acc + xs[k] * w1_ref[m, k]
            hs.append(jnp.maximum(acc + b1_ref[m], 0.0))

        # conv2 + sigmoid: y_o = sigmoid(sum_m w2[o,m] * h_m + b2[o])
        for o in range(c_out):
            acc = hs[0] * w2_ref[o, 0] + b2_ref[o]      # bias folded in
            for m in range(1, c_mid):
                acc = acc + hs[m] * w2_ref[o, m]
            sig = pl.reciprocal(1.0 + jnp.exp(-acc), approx=True)
            o_ref[0, o] = sig.astype(o_ref.dtype)

    return kernel


def _plan_pixel_tiling(hw, bytes_per_pixel):
    """Pick (R_pad, S): padded row count (rows of 128 px) and rows per step."""
    rows = -(-hw // _LANE)
    # Target ~8 MiB of HBM traffic per grid step (amortizes the ~0.35 us
    # per-step overhead to <5% at 0.8-3.2 TB/s), capped so the double-buffered
    # VMEM footprint stays comfortably inside v7x's budget.
    target_rows = max(_SUBLANE, (8 * 1024 * 1024) // (_LANE * bytes_per_pixel))
    target_rows = min(target_rows, 2048)
    if rows <= target_rows:
        return rows, rows                      # single step along pixel axis
    # Keep >= 4 steps along the pixel axis (v7x: 2 TCs, plus pipelining).
    s = min(target_rows, -(-rows // 4))
    s = max(_SUBLANE, (s // _SUBLANE) * _SUBLANE)
    r_pad = -(-rows // s) * s
    return r_pad, s


@jax.jit
def attention_head(x_nchw, w1, b1, w2, b2):
    """x_nchw: (N, C_in, H, W); w1: (C_mid, C_in); w2: (C_out, C_mid) (torch layout)."""
    N, C_in, H, W = x_nchw.shape
    C_mid = w1.shape[0]
    C_out = w2.shape[0]
    HW = H * W
    dtype = x_nchw.dtype

    bytes_per_pixel = (C_in + C_out) * jnp.dtype(dtype).itemsize
    R_pad, S = _plan_pixel_tiling(HW, bytes_per_pixel)
    HW_pad = R_pad * _LANE

    x3 = x_nchw.reshape(N, C_in, HW)           # free view of NCHW
    if HW_pad != HW:
        x3 = jnp.pad(x3, ((0, 0), (0, 0), (0, HW_pad - HW)))
    x4 = x3.reshape(N, C_in, R_pad, _LANE)     # sublane-dense pixel slabs

    # Weights / biases as f32 scalars in SMEM.
    w1f = w1.astype(jnp.float32)
    b1f = b1.reshape(C_mid).astype(jnp.float32)
    w2f = w2.astype(jnp.float32)
    b2f = b2.reshape(C_out).astype(jnp.float32)

    grid = (N, R_pad // S)
    smem_spec = pl.BlockSpec(memory_space=pltpu.MemorySpace.SMEM)

    out4 = pl.pallas_call(
        _make_kernel(C_in, C_mid, C_out),
        out_shape=jax.ShapeDtypeStruct((N, C_out, R_pad, _LANE), dtype),
        grid=grid,
        in_specs=[
            pl.BlockSpec((1, C_in, S, _LANE), lambda n, t: (n, 0, t, 0)),
            smem_spec,  # w1
            smem_spec,  # b1
            smem_spec,  # w2
            smem_spec,  # b2
        ],
        out_specs=pl.BlockSpec((1, C_out, S, _LANE), lambda n, t: (n, 0, t, 0)),
        compiler_params=pltpu.CompilerParams(
            dimension_semantics=("parallel", "parallel"),
            vmem_limit_bytes=48 * 1024 * 1024,
        ),
    )(x4, w1f, b1f, w2f, b2f)

    out = out4.reshape(N, C_out, HW_pad)[:, :, :HW]
    return out.reshape(N, C_out, H, W)


def init_params(key, in_channels, out_channels):
    """Deterministic synthetic init matching nn.Conv2d 1x1 parameter shapes."""
    mid = in_channels // 2
    k1, k2, k3, k4 = jax.random.split(key, 4)
    bound1 = 1.0 / jnp.sqrt(in_channels)
    # conv1.weight: (mid, in, 1, 1) in torch -> stored here as (mid, in)
    w1 = jax.random.uniform(k1, (mid, in_channels), jnp.float32, -bound1, bound1)
    b1 = jax.random.uniform(k2, (mid,), jnp.float32, -bound1, bound1)
    bound2 = 1.0 / jnp.sqrt(mid)
    # conv2.weight: (out, mid, 1, 1) -> (out, mid)
    w2 = jax.random.uniform(k3, (out_channels, mid), jnp.float32, -bound2, bound2)
    b2 = jax.random.uniform(k4, (out_channels,), jnp.float32, -bound2, bound2)
    return w1, b1, w2, b2


def _reference(x, w1, b1, w2, b2):
    N, C_in, H, W = x.shape
    C_out = w2.shape[0]
    x2d = jnp.transpose(x, (0, 2, 3, 1)).reshape(-1, C_in).astype(jnp.float32)
    ref2d = jax.nn.sigmoid(jnp.maximum(x2d @ w1.T + b1, 0.0) @ w2.T + b2)
    return ref2d.reshape(N, H, W, C_out).transpose(0, 3, 1, 2)


if __name__ == "__main__":
    key = jax.random.PRNGKey(0)
    kx, kp = jax.random.split(key)

    N, C_in, H, W = 2, 4, 16, 16
    C_out = 8

    x = jax.random.normal(kx, (N, C_in, H, W), jnp.float32)
    w1, b1, w2, b2 = init_params(kp, C_in, C_out)

    out = jax.block_until_ready(attention_head(x, w1, b1, w2, b2))
    ref = _reference(x, w1, b1, w2, b2)
    assert out.shape == (N, C_out, H, W)
    # approx-reciprocal sigmoid epilogue -> slightly looser than exact f32
    assert jnp.allclose(out, ref, atol=5e-3, rtol=5e-3)

    # bf16 activation-traffic path (same kernel, half the HBM bytes)
    out_bf16 = jax.block_until_ready(
        attention_head(x.astype(jnp.bfloat16), w1, b1, w2, b2))
    assert jnp.allclose(out_bf16.astype(jnp.float32), ref, atol=3e-2, rtol=3e-2)

    # ragged spatial size (H*W not a multiple of 128) exercises the pad path
    xr = jax.random.normal(kx, (N, C_in, 12, 13), jnp.float32)
    out_r = jax.block_until_ready(attention_head(xr, w1, b1, w2, b2))
    ref_r = _reference(xr, w1, b1, w2, b2)
    assert out_r.shape == (N, C_out, 12, 13)
    assert jnp.allclose(out_r, ref_r, atol=5e-3, rtol=5e-3)

    print("KERNEL_OK")
</pallas_src>

<mosaic_0001>
module attributes {stable_mosaic.version = 11 : i64} {
  func.func @kernel(%arg0: i32, %arg1: i32, %arg2: memref<1x4x2x128xf32, #tpu.memory_space<vmem>>, %arg3: memref<2x4xf32, #tpu.memory_space<smem>>, %arg4: memref<2xf32, #tpu.memory_space<smem>>, %arg5: memref<8x2xf32, #tpu.memory_space<smem>>, %arg6: memref<8xf32, #tpu.memory_space<smem>>, %arg7: memref<1x8x2x128xf32, #tpu.memory_space<vmem>>) attributes {dimension_semantics = [#tpu.dimension_semantics<parallel>, #tpu.dimension_semantics<parallel>], iteration_bounds = array<i64: 2, 1>, scalar_prefetch = 0 : i64, scratch_operands = 0 : i64, tpu.core_type = #tpu.core_type<tc>, window_params = [{transform_indices = @transform_0, window_bounds = array<i64: 1, 4, 2, 128>}, {transform_indices = @transform_1, window_bounds = array<i64: 2, 4>}, {transform_indices = @transform_2, window_bounds = array<i64: 2>}, {transform_indices = @transform_3, window_bounds = array<i64: 8, 2>}, {transform_indices = @transform_4, window_bounds = array<i64: 8>}, {transform_indices = @transform_5, window_bounds = array<i64: 1, 8, 2, 128>}]} {
    %c0 = arith.constant 0 : index
    %c0_0 = arith.constant 0 : index
    %c0_1 = arith.constant 0 : index
    %c0_2 = arith.constant 0 : index
    %0 = vector.load %arg2[%c0, %c0_0, %c0_1, %c0_2] : memref<1x4x2x128xf32, #tpu.memory_space<vmem>>, vector<1x1x2x128xf32>
    %1 = vector.shape_cast %0 : vector<1x1x2x128xf32> to vector<2x128xf32>
    %c0_3 = arith.constant 0 : index
    %c1 = arith.constant 1 : index
    %c0_4 = arith.constant 0 : index
    %c0_5 = arith.constant 0 : index
    %2 = vector.load %arg2[%c0_3, %c1, %c0_4, %c0_5] : memref<1x4x2x128xf32, #tpu.memory_space<vmem>>, vector<1x1x2x128xf32>
    %3 = vector.shape_cast %2 : vector<1x1x2x128xf32> to vector<2x128xf32>
    %c0_6 = arith.constant 0 : index
    %c2 = arith.constant 2 : index
    %c0_7 = arith.constant 0 : index
    %c0_8 = arith.constant 0 : index
    %4 = vector.load %arg2[%c0_6, %c2, %c0_7, %c0_8] : memref<1x4x2x128xf32, #tpu.memory_space<vmem>>, vector<1x1x2x128xf32>
    %5 = vector.shape_cast %4 : vector<1x1x2x128xf32> to vector<2x128xf32>
    %c0_9 = arith.constant 0 : index
    %c3 = arith.constant 3 : index
    %c0_10 = arith.constant 0 : index
    %c0_11 = arith.constant 0 : index
    %6 = vector.load %arg2[%c0_9, %c3, %c0_10, %c0_11] : memref<1x4x2x128xf32, #tpu.memory_space<vmem>>, vector<1x1x2x128xf32>
    %7 = vector.shape_cast %6 : vector<1x1x2x128xf32> to vector<2x128xf32>
    %c0_12 = arith.constant 0 : index
    %c0_13 = arith.constant 0 : index
    %8 = memref.load %arg3[%c0_12, %c0_13] : memref<2x4xf32, #tpu.memory_space<smem>>
    %9 = vector.broadcast %8 : f32 to vector<2x128xf32>
    %10 = arith.mulf %1, %9 : vector<2x128xf32>
    %c0_14 = arith.constant 0 : index
    %c1_15 = arith.constant 1 : index
    %11 = memref.load %arg3[%c0_14, %c1_15] : memref<2x4xf32, #tpu.memory_space<smem>>
    %12 = vector.broadcast %11 : f32 to vector<2x128xf32>
    %13 = arith.mulf %3, %12 : vector<2x128xf32>
    %14 = arith.addf %10, %13 : vector<2x128xf32>
    %c0_16 = arith.constant 0 : index
    %c2_17 = arith.constant 2 : index
    %15 = memref.load %arg3[%c0_16, %c2_17] : memref<2x4xf32, #tpu.memory_space<smem>>
    %16 = vector.broadcast %15 : f32 to vector<2x128xf32>
    %17 = arith.mulf %5, %16 : vector<2x128xf32>
    %18 = arith.addf %14, %17 : vector<2x128xf32>
    %c0_18 = arith.constant 0 : index
    %c3_19 = arith.constant 3 : index
    %19 = memref.load %arg3[%c0_18, %c3_19] : memref<2x4xf32, #tpu.memory_space<smem>>
    %20 = vector.broadcast %19 : f32 to vector<2x128xf32>
    %21 = arith.mulf %7, %20 : vector<2x128xf32>
    %22 = arith.addf %18, %21 : vector<2x128xf32>
    %c0_20 = arith.constant 0 : index
    %23 = memref.load %arg4[%c0_20] : memref<2xf32, #tpu.memory_space<smem>>
    %24 = vector.broadcast %23 : f32 to vector<2x128xf32>
    %25 = arith.addf %22, %24 : vector<2x128xf32>
    %cst = arith.constant 0.000000e+00 : f32
    %26 = vector.broadcast %cst : f32 to vector<2x128xf32>
    %27 = arith.maximumf %25, %26 : vector<2x128xf32>
    %c1_21 = arith.constant 1 : index
    %c0_22 = arith.constant 0 : index
    %28 = memref.load %arg3[%c1_21, %c0_22] : memref<2x4xf32, #tpu.memory_space<smem>>
    %29 = vector.broadcast %28 : f32 to vector<2x128xf32>
    %30 = arith.mulf %1, %29 : vector<2x128xf32>
    %c1_23 = arith.constant 1 : index
    %c1_24 = arith.constant 1 : index
    %31 = memref.load %arg3[%c1_23, %c1_24] : memref<2x4xf32, #tpu.memory_space<smem>>
    %32 = vector.broadcast %31 : f32 to vector<2x128xf32>
    %33 = arith.mulf %3, %32 : vector<2x128xf32>
    %34 = arith.addf %30, %33 : vector<2x128xf32>
    %c1_25 = arith.constant 1 : index
    %c2_26 = arith.constant 2 : index
    %35 = memref.load %arg3[%c1_25, %c2_26] : memref<2x4xf32, #tpu.memory_space<smem>>
    %36 = vector.broadcast %35 : f32 to vector<2x128xf32>
    %37 = arith.mulf %5, %36 : vector<2x128xf32>
    %38 = arith.addf %34, %37 : vector<2x128xf32>
    %c1_27 = arith.constant 1 : index
    %c3_28 = arith.constant 3 : index
    %39 = memref.load %arg3[%c1_27, %c3_28] : memref<2x4xf32, #tpu.memory_space<smem>>
    %40 = vector.broadcast %39 : f32 to vector<2x128xf32>
    %41 = arith.mulf %7, %40 : vector<2x128xf32>
    %42 = arith.addf %38, %41 : vector<2x128xf32>
    %c1_29 = arith.constant 1 : index
    %43 = memref.load %arg4[%c1_29] : memref<2xf32, #tpu.memory_space<smem>>
    %44 = vector.broadcast %43 : f32 to vector<2x128xf32>
    %45 = arith.addf %42, %44 : vector<2x128xf32>
    %cst_30 = arith.constant 0.000000e+00 : f32
    %46 = vector.broadcast %cst_30 : f32 to vector<2x128xf32>
    %47 = arith.maximumf %45, %46 : vector<2x128xf32>
    %c0_31 = arith.constant 0 : index
    %c0_32 = arith.constant 0 : index
    %48 = memref.load %arg5[%c0_31, %c0_32] : memref<8x2xf32, #tpu.memory_space<smem>>
    %49 = vector.broadcast %48 : f32 to vector<2x128xf32>
    %50 = arith.mulf %27, %49 : vector<2x128xf32>
    %c0_33 = arith.constant 0 : index
    %51 = memref.load %arg6[%c0_33] : memref<8xf32, #tpu.memory_space<smem>>
    %52 = vector.broadcast %51 : f32 to vector<2x128xf32>
    %53 = arith.addf %50, %52 : vector<2x128xf32>
    %c0_34 = arith.constant 0 : index
    %c1_35 = arith.constant 1 : index
    %54 = memref.load %arg5[%c0_34, %c1_35] : memref<8x2xf32, #tpu.memory_space<smem>>
    %55 = vector.broadcast %54 : f32 to vector<2x128xf32>
    %56 = arith.mulf %47, %55 : vector<2x128xf32>
    %57 = arith.addf %53, %56 : vector<2x128xf32>
    %cst_36 = arith.constant 0.000000e+00 : f32
    %58 = vector.broadcast %cst_36 : f32 to vector<2x128xf32>
    %59 = arith.subf %58, %57 : vector<2x128xf32>
    %60 = math.exp %59 : vector<2x128xf32>
    %cst_37 = arith.constant 1.000000e+00 : f32
    %61 = vector.broadcast %cst_37 : f32 to vector<2x128xf32>
    %62 = arith.addf %61, %60 : vector<2x128xf32>
    %63 = tpu.reciprocal %62 {approx = true} : vector<2x128xf32> -> vector<2x128xf32>
    %c0_38 = arith.constant 0 : index
    %c0_39 = arith.constant 0 : index
    %c0_40 = arith.constant 0 : index
    %c0_41 = arith.constant 0 : index
    %64 = vector.load %arg7[%c0_38, %c0_39, %c0_40, %c0_41] : memref<1x8x2x128xf32, #tpu.memory_space<vmem>>, vector<1x1x2x128xf32>
    %65 = vector.shape_cast %64 : vector<1x1x2x128xf32> to vector<2x128xf32>
    %66 = vector.shape_cast %63 : vector<2x128xf32> to vector<1x1x2x128xf32>
    tpu.vector_store %arg7[%c0_38, %c0_39, %c0_40, %c0_41], %66 {strides = array<i32>} : memref<1x8x2x128xf32, #tpu.memory_space<vmem>>, vector<1x1x2x128xf32>,
    %c1_42 = arith.constant 1 : index
    %c0_43 = arith.constant 0 : index
    %67 = memref.load %arg5[%c1_42, %c0_43] : memref<8x2xf32, #tpu.memory_space<smem>>
    %68 = vector.broadcast %67 : f32 to vector<2x128xf32>
    %69 = arith.mulf %27, %68 : vector<2x128xf32>
    %c1_44 = arith.constant 1 : index
    %70 = memref.load %arg6[%c1_44] : memref<8xf32, #tpu.memory_space<smem>>
    %71 = vector.broadcast %70 : f32 to vector<2x128xf32>
    %72 = arith.addf %69, %71 : vector<2x128xf32>
    %c1_45 = arith.constant 1 : index
    %c1_46 = arith.constant 1 : index
    %73 = memref.load %arg5[%c1_45, %c1_46] : memref<8x2xf32, #tpu.memory_space<smem>>
    %74 = vector.broadcast %73 : f32 to vector<2x128xf32>
    %75 = arith.mulf %47, %74 : vector<2x128xf32>
    %76 = arith.addf %72, %75 : vector<2x128xf32>
    %cst_47 = arith.constant 0.000000e+00 : f32
    %77 = vector.broadcast %cst_47 : f32 to vector<2x128xf32>
    %78 = arith.subf %77, %76 : vector<2x128xf32>
    %79 = math.exp %78 : vector<2x128xf32>
    %cst_48 = arith.constant 1.000000e+00 : f32
    %80 = vector.broadcast %cst_48 : f32 to vector<2x128xf32>
    %81 = arith.addf %80, %79 : vector<2x128xf32>
    %82 = tpu.reciprocal %81 {approx = true} : vector<2x128xf32> -> vector<2x128xf32>
    %c0_49 = arith.constant 0 : index
    %c1_50 = arith.constant 1 : index
    %c0_51 = arith.constant 0 : index
    %c0_52 = arith.constant 0 : index
    %83 = vector.load %arg7[%c0_49, %c1_50, %c0_51, %c0_52] : memref<1x8x2x128xf32, #tpu.memory_space<vmem>>, vector<1x1x2x128xf32>
    %84 = vector.shape_cast %83 : vector<1x1x2x128xf32> to vector<2x128xf32>
    %85 = vector.shape_cast %82 : vector<2x128xf32> to vector<1x1x2x128xf32>
    tpu.vector_store %arg7[%c0_49, %c1_50, %c0_51, %c0_52], %85 {strides = array<i32>} : memref<1x8x2x128xf32, #tpu.memory_space<vmem>>, vector<1x1x2x128xf32>,
    %c2_53 = arith.constant 2 : index
    %c0_54 = arith.constant 0 : index
    %86 = memref.load %arg5[%c2_53, %c0_54] : memref<8x2xf32, #tpu.memory_space<smem>>
    %87 = vector.broadcast %86 : f32 to vector<2x128xf32>
    %88 = arith.mulf %27, %87 : vector<2x128xf32>
    %c2_55 = arith.constant 2 : index
    %89 = memref.load %arg6[%c2_55] : memref<8xf32, #tpu.memory_space<smem>>
    %90 = vector.broadcast %89 : f32 to vector<2x128xf32>
    %91 = arith.addf %88, %90 : vector<2x128xf32>
    %c2_56 = arith.constant 2 : index
    %c1_57 = arith.constant 1 : index
    %92 = memref.load %arg5[%c2_56, %c1_57] : memref<8x2xf32, #tpu.memory_space<smem>>
    %93 = vector.broadcast %92 : f32 to vector<2x128xf32>
    %94 = arith.mulf %47, %93 : vector<2x128xf32>
    %95 = arith.addf %91, %94 : vector<2x128xf32>
    %cst_58 = arith.constant 0.000000e+00 : f32
    %96 = vector.broadcast %cst_58 : f32 to vector<2x128xf32>
    %97 = arith.subf %96, %95 : vector<2x128xf32>
    %98 = math.exp %97 : vector<2x128xf32>
    %cst_59 = arith.constant 1.000000e+00 : f32
    %99 = vector.broadcast %cst_59 : f32 to vector<2x128xf32>
    %100 = arith.addf %99, %98 : vector<2x128xf32>
    %101 = tpu.reciprocal %100 {approx = true} : vector<2x128xf32> -> vector<2x128xf32>
    %c0_60 = arith.constant 0 : index
    %c2_61 = arith.constant 2 : index
    %c0_62 = arith.constant 0 : index
    %c0_63 = arith.constant 0 : index
    %102 = vector.load %arg7[%c0_60, %c2_61, %c0_62, %c0_63] : memref<1x8x2x128xf32, #tpu.memory_space<vmem>>, vector<1x1x2x128xf32>
    %103 = vector.shape_cast %102 : vector<1x1x2x128xf32> to vector<2x128xf32>
    %104 = vector.shape_cast %101 : vector<2x128xf32> to vector<1x1x2x128xf32>
    tpu.vector_store %arg7[%c0_60, %c2_61, %c0_62, %c0_63], %104 {strides = array<i32>} : memref<1x8x2x128xf32, #tpu.memory_space<vmem>>, vector<1x1x2x128xf32>,
    %c3_64 = arith.constant 3 : index
    %c0_65 = arith.constant 0 : index
    %105 = memref.load %arg5[%c3_64, %c0_65] : memref<8x2xf32, #tpu.memory_space<smem>>
    %106 = vector.broadcast %105 : f32 to vector<2x128xf32>
    %107 = arith.mulf %27, %106 : vector<2x128xf32>
    %c3_66 = arith.constant 3 : index
    %108 = memref.load %arg6[%c3_66] : memref<8xf32, #tpu.memory_space<smem>>
    %109 = vector.broadcast %108 : f32 to vector<2x128xf32>
    %110 = arith.addf %107, %109 : vector<2x128xf32>
    %c3_67 = arith.constant 3 : index
    %c1_68 = arith.constant 1 : index
    %111 = memref.load %arg5[%c3_67, %c1_68] : memref<8x2xf32, #tpu.memory_space<smem>>
    %112 = vector.broadcast %111 : f32 to vector<2x128xf32>
    %113 = arith.mulf %47, %112 : vector<2x128xf32>
    %114 = arith.addf %110, %113 : vector<2x128xf32>
    %cst_69 = arith.constant 0.000000e+00 : f32
    %115 = vector.broadcast %cst_69 : f32 to vector<2x128xf32>
    %116 = arith.subf %115, %114 : vector<2x128xf32>
    %117 = math.exp %116 : vector<2x128xf32>
    %cst_70 = arith.constant 1.000000e+00 : f32
    %118 = vector.broadcast %cst_70 : f32 to vector<2x128xf32>
    %119 = arith.addf %118, %117 : vector<2x128xf32>
    %120 = tpu.reciprocal %119 {approx = true} : vector<2x128xf32> -> vector<2x128xf32>
    %c0_71 = arith.constant 0 : index
    %c3_72 = arith.constant 3 : index
    %c0_73 = arith.constant 0 : index
    %c0_74 = arith.constant 0 : index
    %121 = vector.load %arg7[%c0_71, %c3_72, %c0_73, %c0_74] : memref<1x8x2x128xf32, #tpu.memory_space<vmem>>, vector<1x1x2x128xf32>
    %122 = vector.shape_cast %121 : vector<1x1x2x128xf32> to vector<2x128xf32>
    %123 = vector.shape_cast %120 : vector<2x128xf32> to vector<1x1x2x128xf32>
    tpu.vector_store %arg7[%c0_71, %c3_72, %c0_73, %c0_74], %123 {strides = array<i32>} : memref<1x8x2x128xf32, #tpu.memory_space<vmem>>, vector<1x1x2x128xf32>,
    %c4 = arith.constant 4 : index
    %c0_75 = arith.constant 0 : index
    %124 = memref.load %arg5[%c4, %c0_75] : memref<8x2xf32, #tpu.memory_space<smem>>
    %125 = vector.broadcast %124 : f32 to vector<2x128xf32>
    %126 = arith.mulf %27, %125 : vector<2x128xf32>
    %c4_76 = arith.constant 4 : index
    %127 = memref.load %arg6[%c4_76] : memref<8xf32, #tpu.memory_space<smem>>
    %128 = vector.broadcast %127 : f32 to vector<2x128xf32>
    %129 = arith.addf %126, %128 : vector<2x128xf32>
    %c4_77 = arith.constant 4 : index
    %c1_78 = arith.constant 1 : index
    %130 = memref.load %arg5[%c4_77, %c1_78] : memref<8x2xf32, #tpu.memory_space<smem>>
    %131 = vector.broadcast %130 : f32 to vector<2x128xf32>
    %132 = arith.mulf %47, %131 : vector<2x128xf32>
    %133 = arith.addf %129, %132 : vector<2x128xf32>
    %cst_79 = arith.constant 0.000000e+00 : f32
    %134 = vector.broadcast %cst_79 : f32 to vector<2x128xf32>
    %135 = arith.subf %134, %133 : vector<2x128xf32>
    %136 = math.exp %135 : vector<2x128xf32>
    %cst_80 = arith.constant 1.000000e+00 : f32
    %137 = vector.broadcast %cst_80 : f32 to vector<2x128xf32>
    %138 = arith.addf %137, %136 : vector<2x128xf32>
    %139 = tpu.reciprocal %138 {approx = true} : vector<2x128xf32> -> vector<2x128xf32>
    %c0_81 = arith.constant 0 : index
    %c4_82 = arith.constant 4 : index
    %c0_83 = arith.constant 0 : index
    %c0_84 = arith.constant 0 : index
    %140 = vector.load %arg7[%c0_81, %c4_82, %c0_83, %c0_84] : memref<1x8x2x128xf32, #tpu.memory_space<vmem>>, vector<1x1x2x128xf32>
    %141 = vector.shape_cast %140 : vector<1x1x2x128xf32> to vector<2x128xf32>
    %142 = vector.shape_cast %139 : vector<2x128xf32> to vector<1x1x2x128xf32>
    tpu.vector_store %arg7[%c0_81, %c4_82, %c0_83, %c0_84], %142 {strides = array<i32>} : memref<1x8x2x128xf32, #tpu.memory_space<vmem>>, vector<1x1x2x128xf32>,
    %c5 = arith.constant 5 : index
    %c0_85 = arith.constant 0 : index
    %143 = memref.load %arg5[%c5, %c0_85] : memref<8x2xf32, #tpu.memory_space<smem>>
    %144 = vector.broadcast %143 : f32 to vector<2x128xf32>
    %145 = arith.mulf %27, %144 : vector<2x128xf32>
    %c5_86 = arith.constant 5 : index
    %146 = memref.load %arg6[%c5_86] : memref<8xf32, #tpu.memory_space<smem>>
    %147 = vector.broadcast %146 : f32 to vector<2x128xf32>
    %148 = arith.addf %145, %147 : vector<2x128xf32>
    %c5_87 = arith.constant 5 : index
    %c1_88 = arith.constant 1 : index
    %149 = memref.load %arg5[%c5_87, %c1_88] : memref<8x2xf32, #tpu.memory_space<smem>>
    %150 = vector.broadcast %149 : f32 to vector<2x128xf32>
    %151 = arith.mulf %47, %150 : vector<2x128xf32>
    %152 = arith.addf %148, %151 : vector<2x128xf32>
    %cst_89 = arith.constant 0.000000e+00 : f32
    %153 = vector.broadcast %cst_89 : f32 to vector<2x128xf32>
    %154 = arith.subf %153, %152 : vector<2x128xf32>
    %155 = math.exp %154 : vector<2x128xf32>
    %cst_90 = arith.constant 1.000000e+00 : f32
    %156 = vector.broadcast %cst_90 : f32 to vector<2x128xf32>
    %157 = arith.addf %156, %155 : vector<2x128xf32>
    %158 = tpu.reciprocal %157 {approx = true} : vector<2x128xf32> -> vector<2x128xf32>
    %c0_91 = arith.constant 0 : index
    %c5_92 = arith.constant 5 : index
    %c0_93 = arith.constant 0 : index
    %c0_94 = arith.constant 0 : index
    %159 = vector.load %arg7[%c0_91, %c5_92, %c0_93, %c0_94] : memref<1x8x2x128xf32, #tpu.memory_space<vmem>>, vector<1x1x2x128xf32>
    %160 = vector.shape_cast %159 : vector<1x1x2x128xf32> to vector<2x128xf32>
    %161 = vector.shape_cast %158 : vector<2x128xf32> to vector<1x1x2x128xf32>
    tpu.vector_store %arg7[%c0_91, %c5_92, %c0_93, %c0_94], %161 {strides = array<i32>} : memref<1x8x2x128xf32, #tpu.memory_space<vmem>>, vector<1x1x2x128xf32>,
    %c6 = arith.constant 6 : index
    %c0_95 = arith.constant 0 : index
    %162 = memref.load %arg5[%c6, %c0_95] : memref<8x2xf32, #tpu.memory_space<smem>>
    %163 = vector.broadcast %162 : f32 to vector<2x128xf32>
    %164 = arith.mulf %27, %163 : vector<2x128xf32>
    %c6_96 = arith.constant 6 : index
    %165 = memref.load %arg6[%c6_96] : memref<8xf32, #tpu.memory_space<smem>>
    %166 = vector.broadcast %165 : f32 to vector<2x128xf32>
    %167 = arith.addf %164, %166 : vector<2x128xf32>
    %c6_97 = arith.constant 6 : index
    %c1_98 = arith.constant 1 : index
    %168 = memref.load %arg5[%c6_97, %c1_98] : memref<8x2xf32, #tpu.memory_space<smem>>
    %169 = vector.broadcast %168 : f32 to vector<2x128xf32>
    %170 = arith.mulf %47, %169 : vector<2x128xf32>
    %171 = arith.addf %167, %170 : vector<2x128xf32>
    %cst_99 = arith.constant 0.000000e+00 : f32
    %172 = vector.broadcast %cst_99 : f32 to vector<2x128xf32>
    %173 = arith.subf %172, %171 : vector<2x128xf32>
    %174 = math.exp %173 : vector<2x128xf32>
    %cst_100 = arith.constant 1.000000e+00 : f32
    %175 = vector.broadcast %cst_100 : f32 to vector<2x128xf32>
    %176 = arith.addf %175, %174 : vector<2x128xf32>
    %177 = tpu.reciprocal %176 {approx = true} : vector<2x128xf32> -> vector<2x128xf32>
    %c0_101 = arith.constant 0 : index
    %c6_102 = arith.constant 6 : index
    %c0_103 = arith.constant 0 : index
    %c0_104 = arith.constant 0 : index
    %178 = vector.load %arg7[%c0_101, %c6_102, %c0_103, %c0_104] : memref<1x8x2x128xf32, #tpu.memory_space<vmem>>, vector<1x1x2x128xf32>
    %179 = vector.shape_cast %178 : vector<1x1x2x128xf32> to vector<2x128xf32>
    %180 = vector.shape_cast %177 : vector<2x128xf32> to vector<1x1x2x128xf32>
    tpu.vector_store %arg7[%c0_101, %c6_102, %c0_103, %c0_104], %180 {strides = array<i32>} : memref<1x8x2x128xf32, #tpu.memory_space<vmem>>, vector<1x1x2x128xf32>,
    %c7 = arith.constant 7 : index
    %c0_105 = arith.constant 0 : index
    %181 = memref.load %arg5[%c7, %c0_105] : memref<8x2xf32, #tpu.memory_space<smem>>
    %182 = vector.broadcast %181 : f32 to vector<2x128xf32>
    %183 = arith.mulf %27, %182 : vector<2x128xf32>
    %c7_106 = arith.constant 7 : index
    %184 = memref.load %arg6[%c7_106] : memref<8xf32, #tpu.memory_space<smem>>
    %185 = vector.broadcast %184 : f32 to vector<2x128xf32>
    %186 = arith.addf %183, %185 : vector<2x128xf32>
    %c7_107 = arith.constant 7 : index
    %c1_108 = arith.constant 1 : index
    %187 = memref.load %arg5[%c7_107, %c1_108] : memref<8x2xf32, #tpu.memory_space<smem>>
    %188 = vector.broadcast %187 : f32 to vector<2x128xf32>
    %189 = arith.mulf %47, %188 : vector<2x128xf32>
    %190 = arith.addf %186, %189 : vector<2x128xf32>
    %cst_109 = arith.constant 0.000000e+00 : f32
    %191 = vector.broadcast %cst_109 : f32 to vector<2x128xf32>
    %192 = arith.subf %191, %190 : vector<2x128xf32>
    %193 = math.exp %192 : vector<2x128xf32>
    %cst_110 = arith.constant 1.000000e+00 : f32
    %194 = vector.broadcast %cst_110 : f32 to vector<2x128xf32>
    %195 = arith.addf %194, %193 : vector<2x128xf32>
    %196 = tpu.reciprocal %195 {approx = true} : vector<2x128xf32> -> vector<2x128xf32>
    %c0_111 = arith.constant 0 : index
    %c7_112 = arith.constant 7 : index
    %c0_113 = arith.constant 0 : index
    %c0_114 = arith.constant 0 : index
    %197 = vector.load %arg7[%c0_111, %c7_112, %c0_113, %c0_114] : memref<1x8x2x128xf32, #tpu.memory_space<vmem>>, vector<1x1x2x128xf32>
    %198 = vector.shape_cast %197 : vector<1x1x2x128xf32> to vector<2x128xf32>
    %199 = vector.shape_cast %196 : vector<2x128xf32> to vector<1x1x2x128xf32>
    tpu.vector_store %arg7[%c0_111, %c7_112, %c0_113, %c0_114], %199 {strides = array<i32>} : memref<1x8x2x128xf32, #tpu.memory_space<vmem>>, vector<1x1x2x128xf32>,
    return
  }
  func.func @transform_0(%arg0: i32, %arg1: i32) -> (i32, i32, i32, i32) {
    %c0_i32 = arith.constant 0 : i32
    %c0_i32_0 = arith.constant 0 : i32
    %c0_i32_1 = arith.constant 0 : i32
    return %arg0, %c0_i32, %arg1, %c0_i32_0 : i32, i32, i32, i32
  }
  func.func @transform_1(%arg0: i32, %arg1: i32) -> (i32, i32) {
    %c0_i32 = arith.constant 0 : i32
    %c0_i32_0 = arith.constant 0 : i32
    %c0_i32_1 = arith.constant 0 : i32
    return %c0_i32, %c0_i32_0 : i32, i32
  }
  func.func @transform_2(%arg0: i32, %arg1: i32) -> i32 {
    %c0_i32 = arith.constant 0 : i32
    %c0_i32_0 = arith.constant 0 : i32
    return %c0_i32 : i32
  }
  func.func @transform_3(%arg0: i32, %arg1: i32) -> (i32, i32) {
    %c0_i32 = arith.constant 0 : i32
    %c0_i32_0 = arith.constant 0 : i32
    %c0_i32_1 = arith.constant 0 : i32
    return %c0_i32, %c0_i32_0 : i32, i32
  }
  func.func @transform_4(%arg0: i32, %arg1: i32) -> i32 {
    %c0_i32 = arith.constant 0 : i32
    %c0_i32_0 = arith.constant 0 : i32
    return %c0_i32 : i32
  }
  func.func @transform_5(%arg0: i32, %arg1: i32) -> (i32, i32, i32, i32) {
    %c0_i32 = arith.constant 0 : i32
    %c0_i32_0 = arith.constant 0 : i32
    %c0_i32_1 = arith.constant 0 : i32
    return %arg0, %c0_i32, %arg1, %c0_i32_0 : i32, i32, i32, i32
  }
}

</mosaic_0001>

<bundles_post_ra>
// kernel: attention_head.1
= control target key start
LH: loop header
LB: loop body
LE: loop exit
PB: predicated region body
PF: predicated region fallthrough
CT: control target
= control target key end

     0   :  { %10 = vsyncpa [#allocation3], 0  ;;  %s1066_s0 = inlined_call_operand.vmem [shape: f32[2,4,2,128], index: 0, kind: input, shape index: {}]   ;;  %s1067_s1 = inlined_call_operand.vmem [shape: f32[2,4], index: 1, kind: input, shape index: {}]   ;;  %s1068_s2 = inlined_call_operand.vmem [shape: f32[2], index: 2, kind: input, shape index: {}]   ;;  %s1069_s3 = inlined_call_operand.vmem [shape: f32[8,2], index: 3, kind: input, shape index: {}]   ;;  %s1070_s4 = inlined_call_operand.vmem [shape: f32[8], index: 4, kind: input, shape index: {}]   ;;  %s1071_s5 = inlined_call_operand.vmem [shape: f32[2,8,2,128], index: 5, kind: output, shape index: {}]  }
   0x1   :  { %11 = vsyncpa [#allocation5], 0 }
   0x2   :  { %12 = vsyncpa [#allocation8], 0  ;;  %s901_s18 = smov 0   ;;  %s903_s19 = smov 0  }
   0x3   :  { %s905_s20 = smov 0  }
   0x4 LB: > { %s199_s23 = sshll.u32 %s1068_s2, 4  ;;  %s613_s24 = sadd.s32 4294967295, %s865_s20   ;;  %s865_s20 = sphi %s905_s20, %s18_s20   ;;  %s861_s19 = sphi %s903_s19, %s1082_s19   ;;  %s857_s18 = sphi %s901_s18, %s1081_s18   ;;  %s200_s23 = int_to_ptr.vmem [resolvable:$true] %s199_s23 }
   0x5   : > { %p615_p0 = scmp.ge.s32.totalorder %s865_s20, 1  ;;  %p175_p1 = scmp.lt.s32.totalorder %s865_s20, 3 }
   0x6   : > { %p922_p2 = scmp.eq.s32.totalorder %s613_s24, 0  ;;  %s30_s27 = sadd.s32 1, %s861_s19 }
   0x7   : > { %p926_p3 = pnand %p615_p0, %p175_p1  ;;  %s188_s30 = sshll.u32 %s1067_s1, 4  ;;  %s189_s30 = int_to_ptr.vmem [resolvable:$true] %s188_s30 }
   0x8   : > { %s1075_s25 = scalar_select %p922_p2, 1, 0 }
   0x9   : > { %s1076_s26 = scalar_select %p926_p3, 1, 0 }
   0xa   : > { %p690_p4 = pneg %p926_p3  ;;  %p942_p6 = scmp.ge.s32.totalorder %s30_s27, 2 }
   0xb   : > { %s210_s10 = sshll.u32 %s1069_s3, 4  ;;  %s771_s11 = scalar_lea.vmem %s200_s23, 16  ;;  %s211_s10 = int_to_ptr.vmem [resolvable:$true] %s210_s10 }
   0xc   : > { %p938_p5 = pnand %p922_p2, %p690_p4  ;;  %p772_p7 = scmp.ne.s32.totalorder %s200_s23, %s771_s11 }
   0xd   : > { %p779_p11 = scmp.lt.s32.totalorder %s200_s23, %s200_s23  ;;  %p780_p12 = scmp.lt.s32.totalorder %s771_s11, %s771_s11 }
   0xe   : > { %p773_p8 = pneg %p938_p5 }
   0xf   : > { %p781_p13 = por %p780_p12, %p779_p11 }
  0x10   : > { %p774_p9 = pnand %p773_p8, %p772_p7 }
  0x12   : > { %p775_p10 = pneg %p774_p9 }
  0x14   : > { %p782_p0 = pnand %p781_p13, %p775_p10 }
  0x16   : > { %785 = shalt.err (!%p782_p0)
}
  0x17   : > { %s867_s12 = smov [#allocation4]   ;;  %s1084_s27 = smov (%p942_p6, %s30_s27), 0 }
  0x18   : > { %696 = dma.vmem_to_smem (!%p938_p5), %s200_s23, 16, %s867_s12, [#allocation5]  }
  0x19   : > { %s786_s13 = scalar_lea.vmem %s189_s30, 32  ;;  %p794_p9 = scmp.lt.s32.totalorder %s189_s30, %s189_s30 }
  0x1a   : > { %p787_p1 = scmp.ne.s32.totalorder %s189_s30, %s786_s13  ;;  %p795_p2 = scmp.lt.s32.totalorder %s786_s13, %s786_s13 }
  0x1c   : > { %p789_p4 = pnand %p787_p1, %p773_p8  ;;  %p796_p11 = por %p795_p2, %p794_p9 }
  0x1e   : > { %p790_p7 = pneg %p789_p4 }
  0x20   : > { %p797_p10 = pnand %p796_p11, %p790_p7 }
  0x22   : > { %800 = shalt.err (!%p797_p10)
}
  0x23   : > { %s868_s14 = smov [#allocation2]   ;;  %s801_s15 = scalar_lea.vmem %s211_s10, 128 }
  0x24   : > { %693 = dma.vmem_to_smem (!%p938_p5), %s189_s30, 32, %s868_s14, [#allocation3]  }
  0x25   : > { %p802_p6 = scmp.ne.s32.totalorder %s211_s10, %s801_s15  ;;  %p809_p0 = scmp.lt.s32.totalorder %s211_s10, %s211_s10 }
  0x26   : > { %p810_p1 = scmp.lt.s32.totalorder %s801_s15, %s801_s15 }
  0x27   : > { %p804_p12 = pnand %p802_p6, %p773_p8 }
  0x28   : > { %p811_p4 = por %p810_p1, %p809_p0 }
  0x29   : > { %p805_p13 = pneg %p804_p12 }
  0x2b   : > { %p812_p3 = pnand %p811_p4, %p805_p13 }
  0x2d   : > { %815 = shalt.err (!%p812_p3)
}
  0x2e   : > { %s869_s16 = smov [#allocation6]   ;;  %s221_s22 = sshll.u32 %s1070_s4, 4  ;;  %s222_s22 = int_to_ptr.vmem [resolvable:$true] %s221_s22 }
  0x2f   : > { %699 = dma.vmem_to_smem (!%p938_p5), %s211_s10, 128, %s869_s16, [#allocation5]  }
  0x30   : > { %s816_s23 = scalar_lea.vmem %s222_s22, 16  ;;  %p824_p11 = scmp.lt.s32.totalorder %s222_s22, %s222_s22 }
  0x31   : > { %p817_p2 = scmp.ne.s32.totalorder %s222_s22, %s816_s23  ;;  %p825_p10 = scmp.lt.s32.totalorder %s816_s23, %s816_s23 }
  0x33   : > { %p819_p7 = pnand %p817_p2, %p773_p8  ;;  %p826_p6 = por %p825_p10, %p824_p11 }
  0x35   : > { %p820_p9 = pneg %p819_p7 }
  0x37   : > { %p827_p3 = pnand %p826_p6, %p820_p9 }
  0x39   : > { %830 = shalt.err (!%p827_p3)
}
  0x3a   : > { %s870_s24 = smov [#allocation7]   ;;  %p1079_p12 = scmp.ne.s32.totalorder %s1076_s26, 0 }
  0x3b   : > { %702 = dma.vmem_to_smem (!%p938_p5), %s222_s22, 16, %s870_s24, [#allocation8]  }
  0x3c   : > { %245 = sbr.rel (%p1079_p12) target bundleno = 156 (0x9c), region = 40  ;;  %p1080_p13 = scmp.ne.s32.totalorder (!%p1079_p12), %s1075_s25, 0 }
  0x41   : > { %844 = dma.done.wait (%p1080_p13), [#allocation3], 32  }
  0x42   : > { %846 = vsyncadd (%p1080_p13), [#allocation3], 4294967264 }
  0x43   : > { %848 = dma.done.wait (%p1080_p13), [#allocation5], 144  }
  0x44   : > { %850 = vsyncadd (%p1080_p13), [#allocation5], 4294967152 }
  0x45   : > { %852 = dma.done.wait (%p1080_p13), [#allocation8], 16  }
  0x46   : > { %854 = vsyncadd (%p1080_p13), [#allocation8], 4294967280 }
  0x47   : > { %263 = sfence }
  0x48   : > { %p292_p5 = scmp.lt.s32.totalorder %s857_s18, 1  ;;  %s315_s26 = sld [smem:[#allocation2]] }
  0x49   : > { %s633_s28 = sld [smem:[#allocation2 + $0x1]] }
  0x4a   : > { %s1086_s18 = smov (!%p292_p5, %s857_s18), 1  ;;  %s634_s29 = sld [smem:[#allocation2 + $0x2]] }
  0x4b   : > { %s672_s30 = sshll.u32 %s1086_s18, 3  ;;  %s635_s25 = sld [smem:[#allocation2 + $0x3]] }
  0x4c   : > { %s299_s8 = scalar_lea.vmem %s1066_s0, %s672_s30  ;;  %s330_s9 = sld [smem:[#allocation4]] }
  0x4d   : > { %v308_v0 = vld [vmem:[%s299_s8] sm:$0x3]  ;;  %v630_v1 = vld [vmem:[%s299_s8 + $0x2] sm:$0x3]  ;;  %v631_v3 = vld [vmem:[%s299_s8 + $0x4] sm:$0x3] }
  0x4e   : > { %v316_v2 = vstv %s315_s26  ;;  %s636_s10 = sld [smem:[#allocation2 + $0x80]]  ;;  %v632_v10 = vld [vmem:[%s299_s8 + $0x6] sm:$0x3] }
  0x4f   : > { %v317_v4 = vmul.f32 %v316_v2, %v308_v0  ;;  %v319_v5 = vstv %s633_s28  ;;  %s637_s11 = sld [smem:[#allocation2 + $0x81]] }
  0x50   : > { %v320_v6 = vmul.f32 %v630_v1, %v319_v5  ;;  %v323_v7 = vstv %s634_s29  ;;  %s638_s12 = sld [smem:[#allocation2 + $0x82]] }
  0x51   : > { %v324_v9 = vmul.f32 %v631_v3, %v323_v7  ;;  %s639_s13 = sld [smem:[#allocation2 + $0x83]]  ;;  %v327_v12 = vstv %s635_s25 }
  0x52   : > { %v321_v8 = vadd.f32 %v320_v6, %v317_v4  ;;  %s1000_s14 = sld [smem:[#allocation4 + $0x1]]  ;;  %v328_v13 = vmul.f32 %v632_v10, %v327_v12  ;;  %v331_v14 = vstv %s330_s9 }
  0x53   : > { %s353_s15 = sld [smem:[#allocation6]] }
  0x54   : > { %v325_v11 = vadd.f32 %v324_v9, %v321_v8  ;;  %v335_v15 = vstv %s636_s10  ;;  %s1002_s16 = sld [smem:[#allocation7]] }
  0x55   : > { %v336_v17 = vmul.f32 %v335_v15, %v308_v0  ;;  %v338_v18 = vstv %s637_s11  ;;  %s1004_s17 = sld [smem:[#allocation6 + $0x1]] }
  0x56   : > { %v329_v16 = vadd.f32 %v328_v13, %v325_v11  ;;  %v339_v19 = vmul.f32 %v630_v1, %v338_v18  ;;  %v342_v20 = vstv %s638_s12  ;;  %s642_s21 = sld [smem:[#allocation6 + $0x80]] }
  0x57   : > { %v343_v22 = vmul.f32 %v631_v3, %v342_v20  ;;  %v346_v23 = vstv %s639_s13  ;;  %s643_s22 = sld [smem:[#allocation7 + $0x1]] }
  0x58   : > { %v332_v21 = vadd.f32 %v331_v14, %v329_v16  ;;  %v340_v24 = vadd.f32 %v339_v19, %v336_v17  ;;  %v347_v25 = vmul.f32 %v632_v10, %v346_v23  ;;  %s1006_s23 = sld [smem:[#allocation6 + $0x81]]  ;;  %v350_v29 = vstv %s1000_s14 }
  0x59   : > { %v354_v27 = vstv %s353_s15  ;;  %s646_s24 = sld [smem:[#allocation6 + $0x100]] }
  0x5a   : > { %v1008_v26 = vmax.f32 %v332_v21, 0.0  ;;  %v344_v28 = vadd.f32 %v343_v22, %v340_v24  ;;  %s647_s26 = sld [smem:[#allocation7 + $0x2]]  ;;  %v357_v32 = vstv %s1002_s16 }
  0x5b   : > { %s648_s28 = sld [smem:[#allocation6 + $0x101]]  ;;  %v360_v38 = vstv %s1004_s17 }
  0x5c   : > { %v355_v30 = vmul.f32 %v354_v27, %v1008_v26  ;;  %v348_v31 = vadd.f32 %v347_v25, %v344_v28  ;;  %v370_v33 = vstv %s642_s21  ;;  %s650_s29 = sld [smem:[#allocation6 + $0x180]]  ;;  %s673_s21 = sshll.u32 %s1086_s18, 4 }
  0x5d   : > { %v371_v34 = vmul.f32 %v370_v33, %v1008_v26  ;;  %v373_v35 = vstv %s643_s22  ;;  %s1014_s30 = sld [smem:[#allocation7 + $0x3]] }
  0x5e   : > { %v351_v36 = vadd.f32 %v350_v29, %v348_v31  ;;  %s1016_s6 = sld [smem:[#allocation6 + $0x181]]  ;;  %v358_v37 = vadd.f32 %v357_v32, %v355_v30  ;;  %v376_v39 = vstv %s1006_s23 }
  0x5f   : > { %v387_v40 = vstv %s646_s24  ;;  %s654_s7 = sld [smem:[#allocation6 + $0x200]]  ;;  %v374_v42 = vadd.f32 %v373_v35, %v371_v34  ;;  %s307_s24 = scalar_lea.vmem %s1071_s5, %s673_s21 }
  0x60   : > { %v1020_v41 = vmax.f32 %v351_v36, 0.0  ;;  %v388_v43 = vmul.f32 %v387_v40, %v1008_v26  ;;  %v390_v44 = vstv %s647_s26  ;;  %s1023_s8 = sld [smem:[#allocation7 + $0x4]] }
  0x61   : > { %v393_v45 = vstv %s648_s28  ;;  %s656_s25 = sld [smem:[#allocation6 + $0x201]] }
  0x62   : > { %v361_v46 = vmul.f32 %v360_v38, %v1020_v41  ;;  %v377_v47 = vmul.f32 %v376_v39, %v1020_v41  ;;  %v391_v48 = vadd.f32 %v390_v44, %v388_v43  ;;  %v394_v49 = vmul.f32 %v393_v45, %v1020_v41  ;;  %s1028_s9 = sld [smem:[#allocation6 + $0x280]] }
  0x63   : > { %v404_v50 = vstv %s650_s29  ;;  %v407_v51 = vstv %s1014_s30  ;;  %s1031_s10 = sld [smem:[#allocation7 + $0x5]] }
  0x64   : > { %v362_v52 = vadd.f32 %v361_v46, %v358_v37  ;;  %v378_v53 = vadd.f32 %v377_v47, %v374_v42  ;;  %v395_v54 = vadd.f32 %v394_v49, %v391_v48  ;;  %v405_v55 = vmul.f32 %v404_v50, %v1008_v26  ;;  %s660_s11 = sld [smem:[#allocation6 + $0x281]] }
  0x65   : > { %v410_v56 = vstv %s1016_s6  ;;  %v421_v57 = vstv %s654_s7  ;;  %s1035_s12 = sld [smem:[#allocation6 + $0x300]] }
  0x66   : > { %v363_v58 = vsub.f32 0.0, %v362_v52  ;;  %v379_v59 = vsub.f32 0.0, %v378_v53  ;;  %v396_v60 = vsub.f32 0.0, %v395_v54  ;;  %v408_v61 = vadd.f32 %v407_v51, %v405_v55  ;;  %s1037_s13 = sld [smem:[#allocation7 + $0x6]] }
  0x67   : > { %v411_v62 = vmul.f32 %v410_v56, %v1020_v41  ;;  %v422_v63 = vmul.f32 %v421_v57, %v1008_v26  ;;  %v424_v0 = vstv %s1023_s8  ;;  %v427_v1 = vstv %s656_s25  ;;  %s664_s14 = sld [smem:[#allocation6 + $0x301]] }
  0x68   : > { %v364_v2 = vmul.f32 1.442695, %v363_v58  ;;  %v380_v3 = vmul.f32 1.442695, %v379_v59  ;;  %v397_v4 = vmul.f32 1.442695, %v396_v60  ;;  %v428_v5 = vmul.f32 %v427_v1, %v1020_v41 }
  0x69   : > { %v412_v6 = vadd.f32 %v411_v62, %v408_v61  ;;  %v425_v7 = vadd.f32 %v424_v0, %v422_v63  ;;  %v438_v8 = vstv %s1028_s9  ;;  %v441_v9 = vstv %s1031_s10  ;;  %s666_s15 = sld [smem:[#allocation6 + $0x380]] }
  0x6a   : > { %739 = vpow2.f32 %v364_v2  ;;  %v439_v10 = vmul.f32 %v438_v8, %v1008_v26  ;;  %v444_v11 = vstv %s660_s11  ;;  %s667_s16 = sld [smem:[#allocation7 + $0x7]] }
  0x6b   : > { %741 = vpow2.f32 %v380_v3  ;;  %v413_v12 = vsub.f32 0.0, %v412_v6  ;;  %v429_v13 = vadd.f32 %v428_v5, %v425_v7  ;;  %v445_v14 = vmul.f32 %v444_v11, %v1020_v41  ;;  %s668_s17 = sld [smem:[#allocation6 + $0x381]] }
  0x6c   : > { %743 = vpow2.f32 %v397_v4  ;;  %v442_v15 = vadd.f32 %v441_v9, %v439_v10  ;;  %v455_v16 = vstv %s1035_s12  ;;  %v458_v17 = vstv %s1037_s13 }
  0x6d   : > { %v414_v18 = vmul.f32 1.442695, %v413_v12  ;;  %v430_v19 = vsub.f32 0.0, %v429_v13  ;;  %v456_v20 = vmul.f32 %v455_v16, %v1008_v26  ;;  %v461_v21 = vstv %s664_s14 }
  0x6e   : > { %v446_v22 = vadd.f32 %v445_v14, %v442_v15  ;;  %v462_v23 = vmul.f32 %v461_v21, %v1020_v41 }
  0x6f   : > { %745 = vpow2.f32 %v414_v18  ;;  %v431_v24 = vmul.f32 1.442695, %v430_v19  ;;  %v459_v25 = vadd.f32 %v458_v17, %v456_v20  ;;  %v472_v27 = vstv %s666_s15 }
  0x70   : > { %v447_v28 = vsub.f32 0.0, %v446_v22  ;;  %v473_v29 = vmul.f32 %v472_v27, %v1008_v26  ;;  %v475_v30 = vstv %s667_s16 }
  0x71   : > { %747 = vpow2.f32 %v431_v24  ;;  %v463_v31 = vadd.f32 %v462_v23, %v459_v25  ;;  %v478_v32 = vstv %s668_s17 }
  0x72   : > { %v448_v33 = vmul.f32 1.442695, %v447_v28  ;;  %v476_v34 = vadd.f32 %v475_v30, %v473_v29  ;;  %v479_v35 = vmul.f32 %v478_v32, %v1020_v41 }
  0x73   : > { %v464_v36 = vsub.f32 0.0, %v463_v31 }
  0x74   : > { %749 = vpow2.f32 %v448_v33  ;;  %v480_v37 = vadd.f32 %v479_v35, %v476_v34 }
  0x75   : > { %v465_v38 = vmul.f32 1.442695, %v464_v36 }
  0x76   : > { %v481_v39 = vsub.f32 0.0, %v480_v37 }
  0x77   : > { %v740_v40 = vpop.eup %739  ;;  %751 = vpow2.f32 %v465_v38 }
  0x78   : > { %v742_v42 = vpop.eup %741  ;;  %v366_v43 = vadd.f32 1.0, %v740_v40  ;;  %v482_v45 = vmul.f32 1.442695, %v481_v39 }
  0x79   : > { %v744_v44 = vpop.eup %743  ;;  %v382_v26 = vadd.f32 1.0, %v742_v42 }
  0x7a   : > { %753 = vrcp.f32 %v366_v43  ;;  %v399_v46 = vadd.f32 1.0, %v744_v44 }
  0x7b   : > { %755 = vrcp.f32 %v382_v26 }
  0x7c   : > { %v746_v47 = vpop.eup %745  ;;  %757 = vrcp.f32 %v399_v46 }
  0x7d   : > { %v416_v48 = vadd.f32 1.0, %v746_v47  ;;  %759 = vpow2.f32 %v482_v45 }
  0x7e   : > { %v748_v41 = vpop.eup %747 }
  0x7f   : > { %761 = vrcp.f32 %v416_v48  ;;  %v433_v49 = vadd.f32 1.0, %v748_v41 }
  0x81   : > { %v750_v50 = vpop.eup %749  ;;  %763 = vrcp.f32 %v433_v49 }
  0x82   : > { %v450_v51 = vadd.f32 1.0, %v750_v50 }
  0x84   : > { %v752_v52 = vpop.eup %751  ;;  %765 = vrcp.f32 %v450_v51 }
  0x85   : > { %v467_v53 = vadd.f32 1.0, %v752_v52 }
  0x87   : > { %v754_v54 = vpop.eup %753  ;;  %767 = vrcp.f32 %v467_v53 }
  0x88   : > { %v756_v55 = vpop.eup %755  ;;  %368 = vst [vmem:[%s307_s24] sm:$0x3] %v754_v54 }
  0x89   : > { %v758_v56 = vpop.eup %757  ;;  %645 = vst [vmem:[%s307_s24 + $0x2] sm:$0x3] %v756_v55 }
  0x8a   : > { %v760_v57 = vpop.eup %759  ;;  %649 = vst [vmem:[%s307_s24 + $0x4] sm:$0x3] %v758_v56 }
  0x8b   : > { %v484_v58 = vadd.f32 1.0, %v760_v57 }
  0x8c   : > { %v762_v59 = vpop.eup %761 }
  0x8d   : > { %653 = vst [vmem:[%s307_s24 + $0x6] sm:$0x3] %v762_v59  ;;  %769 = vrcp.f32 %v484_v58 }
  0x8e   : > { %v764_v60 = vpop.eup %763 }
  0x8f   : > { %657 = vst [vmem:[%s307_s24 + $0x8] sm:$0x3] %v764_v60 }
  0x91   : > { %v766_v61 = vpop.eup %765 }
  0x92   : > { %661 = vst [vmem:[%s307_s24 + $0xa] sm:$0x3] %v766_v61 }
  0x94   : > { %v768_v62 = vpop.eup %767 }
  0x95   : > { %665 = vst [vmem:[%s307_s24 + $0xc] sm:$0x3] %v768_v62 }
  0x9a   : > { %v770_v63 = vpop.eup %769 }
  0x9b   : > { %669 = vst [vmem:[%s307_s24 + $0xe] sm:$0x3] %v770_v63 }
  0x9c PF: > { %s18_s20 = sadd.s32 1, %s865_s20   ;;  %s1081_s18 = smov %s861_s19 }
  0x9d   : > { %p15_p8 = scmp.ge.s32.totalorder %s18_s20, 4   ;;  %s1082_s19 = smov %s1084_s27 }
  0x9f   :  { %17 = sbr.rel (!%p15_p8) target bundleno = 4 (0x4), region = 97 }
  0xa4   :  { %515 = vsyncpa [#allocation3], 1 }
  0xa5   :  { %517 = vsyncpa [#allocation3 + $0x1], 1 }
  0xa6   :  { %518 = vsyncpa [#allocation5], 1 }
  0xa7   :  { %519 = vsyncpa [#allocation8], 1 }

</bundles_post_ra>
